<compile_context>
chip_gen: v7x
topology: tpu7x:2x2x1
jax: 0.10.0
libtpu: 0.0.40
codegen_flags: <defaults>
</compile_context>

<pallas_src>
import jax
import jax.numpy as jnp
from jax.experimental import pallas as pl
from jax.experimental.pallas import tpu as pltpu


def _round_up(x, m):
    return ((x + m - 1) // m) * m


def _auc_pair_kernel(pi_ref, ti_ref, pj_ref, qj_ref, out_ref, acc_ref):
    """One grid step: (class c, i-tile ii, j-tile jj).

    pi_ref : (1, tb_i, 1)  predictions for i rows, column (sublane) layout
    ti_ref : (1, tb_i, 1)  positive weights t_i (0 for padded rows)
    pj_ref : (1, 1, tb_j)  predictions for j rows, row (lane) layout
    qj_ref : (1, 1, tb_j)  negative weights q_j = 1 - t_j (0 for padded rows)
    out_ref: (1, 128)      per-class accumulator slab (element 0 carries S_c)
    acc_ref: (tb_i, tb_j)  VMEM scratch accumulating q_j * sign(p_i - p_j)
    """
    ii = pl.program_id(1)
    jj = pl.program_id(2)
    n_j = pl.num_programs(2)

    # First step of a class window: reset the per-class accumulator.  The
    # output block stays resident across all (ii, jj) steps of this class.
    @pl.when((ii == 0) & (jj == 0))
    def _init_out():
        out_ref[...] = jnp.zeros_like(out_ref)

    # First j step of an i-tile window: reset the pair accumulator.
    @pl.when(jj == 0)
    def _init_acc():
        acc_ref[...] = jnp.zeros_like(acc_ref)

    pi = pi_ref[0, :, :]          # (tb_i, 1)
    pj = pj_ref[0, :, :]          # (1, tb_j)
    qj = qj_ref[0, :, :]          # (1, tb_j)
    nqj = -qj                     # hoisted small (1, tb_j) negate

    d = pi - pj                   # (tb_i, tb_j) broadcast subtract
    # q_j * sign(d) with sign folded into the selects (ties contribute 0 here).
    acc_ref[...] += jnp.where(d > 0.0, qj, jnp.where(d < 0.0, nqj, 0.0))

    # Last j-tile of this i-tile window: one cross-lane reduce, weight by t_i,
    # one cross-sublane reduce, fold into the per-class scalar.
    @pl.when(jj == n_j - 1)
    def _finalize_i_tile():
        ti = ti_ref[0, :, :]                                   # (tb_i, 1)
        row = jnp.sum(acc_ref[...], axis=1, keepdims=True)     # (tb_i, 1)
        contrib = jnp.sum(ti * row)                            # scalar
        out_ref[...] += contrib


def auc_pallas(pred, target, *, max_tb_i=512, max_tb_j=1024):
    """pred, target: (B, C). Returns (C,) float32 per-class ROC AUC."""
    pred = jnp.asarray(pred, jnp.float32)
    target = jnp.asarray(target, jnp.float32)
    B, C = pred.shape

    # Tile sizes: j on lanes (multiple of 128), i on sublanes; both divide B_pad.
    tb_j = min(max_tb_j, _round_up(B, 128))
    B_pad = _round_up(B, tb_j)
    tb_i = max(d for d in (128, 256, 512) if d <= max_tb_i and B_pad % d == 0)
    n_i = B_pad // tb_i
    n_j = B_pad // tb_j

    # Class-major, zero-padded copies.  Padded rows have zero weight on both
    # the positive (t) and negative (q = 1 - t) side -> contribute nothing.
    pred_t = jnp.zeros((C, B_pad), jnp.float32).at[:, :B].set(pred.T)
    t_w = jnp.zeros((C, B_pad), jnp.float32).at[:, :B].set(target.T)
    q_w = jnp.zeros((C, B_pad), jnp.float32).at[:, :B].set(1.0 - target.T)

    pred_col = pred_t.reshape(C, B_pad, 1)    # i-side, column layout
    t_col = t_w.reshape(C, B_pad, 1)
    pred_row = pred_t.reshape(C, 1, B_pad)    # j-side, row (lane-dense) layout
    q_row = q_w.reshape(C, 1, B_pad)

    out = pl.pallas_call(
        _auc_pair_kernel,
        out_shape=jax.ShapeDtypeStruct((1, C * 128), jnp.float32),
        grid_spec=pltpu.PrefetchScalarGridSpec(
            num_scalar_prefetch=0,
            grid=(C, n_i, n_j),
            in_specs=[
                pl.BlockSpec((1, tb_i, 1), lambda c, i, j: (c, i, 0)),  # p_i
                pl.BlockSpec((1, tb_i, 1), lambda c, i, j: (c, i, 0)),  # t_i
                pl.BlockSpec((1, 1, tb_j), lambda c, i, j: (c, 0, j)),  # p_j
                pl.BlockSpec((1, 1, tb_j), lambda c, i, j: (c, 0, j)),  # q_j
            ],
            out_specs=pl.BlockSpec((1, 128), lambda c, i, j: (0, c)),
            scratch_shapes=[pltpu.VMEM((tb_i, tb_j), jnp.float32)],
        ),
        compiler_params=pltpu.CompilerParams(
            dimension_semantics=("parallel", "arbitrary", "arbitrary")),
    )(pred_col, t_col, pred_row, q_row)

    s = out.reshape(C, 128)[:, 0]                 # S_c per class
    pos = jnp.sum(target, axis=0)
    neg = jnp.sum(1.0 - target, axis=0)
    return 0.5 + s / (2.0 * pos * neg)


def _auc_reference(pred, target):
    """Plain-JAX reference (same Mann-Whitney pairwise formulation)."""
    pred = pred.astype(jnp.float32)
    target = target.astype(jnp.float32)
    gt = (pred[:, None, :] > pred[None, :, :]).astype(jnp.float32)
    eq = (pred[:, None, :] == pred[None, :, :]).astype(jnp.float32)
    w = target[:, None, :] * (1.0 - target[None, :, :])
    num = jnp.sum(w * (gt + 0.5 * eq), axis=(0, 1))
    pos = jnp.sum(target, axis=0)
    neg = jnp.sum(1.0 - target, axis=0)
    return num / (pos * neg)


def _make_inputs(key, B, C):
    k_pred, k_tgt = jax.random.split(key)
    pred = jax.random.uniform(k_pred, (B, C), dtype=jnp.float32)
    target = (jax.random.uniform(k_tgt, (B, C)) > 0.5).astype(jnp.float32)
    # Guarantee every class column has at least one positive and one negative
    # (otherwise ROC AUC is undefined, as in sklearn).
    target = target.at[0, :].set(1.0)
    target = target.at[1, :].set(0.0)
    return pred, target


if __name__ == "__main__":
    key = jax.random.PRNGKey(0)
    k1, k2 = jax.random.split(key)

    # Small shape consistent with the module (batch=8, n_classes=4).
    pred, target = _make_inputs(k1, 8, 4)
    out = auc_pallas(pred, target)
    jax.block_until_ready(out)
    ref = _auc_reference(pred, target)
    if not jnp.allclose(out, ref, atol=1e-5, rtol=1e-5):
        raise AssertionError(f"mismatch (small): kernel={out} ref={ref}")

    # Larger shape to exercise the multi-tile (n_i > 1, n_j > 1) path.
    pred2, target2 = _make_inputs(k2, 1536, 3)
    out2 = auc_pallas(pred2, target2)
    jax.block_until_ready(out2)
    ref2 = _auc_reference(pred2, target2)
    if not jnp.allclose(out2, ref2, atol=1e-5, rtol=1e-5):
        raise AssertionError(f"mismatch (tiled): kernel={out2} ref={ref2}")

    print("KERNEL_OK")
</pallas_src>

<mosaic_0001>
module attributes {stable_mosaic.version = 11 : i64} {
  func.func @_auc_pair_kernel(%arg0: i32, %arg1: i32, %arg2: i32, %arg3: memref<1x128x1xf32, #tpu.memory_space<vmem>>, %arg4: memref<1x128x1xf32, #tpu.memory_space<vmem>>, %arg5: memref<1x1x128xf32, #tpu.memory_space<vmem>>, %arg6: memref<1x1x128xf32, #tpu.memory_space<vmem>>, %arg7: memref<1x128xf32, #tpu.memory_space<vmem>>, %arg8: memref<128x128xf32, #tpu.memory_space<vmem>>) attributes {dimension_semantics = [#tpu.dimension_semantics<parallel>, #tpu.dimension_semantics<arbitrary>, #tpu.dimension_semantics<arbitrary>], iteration_bounds = array<i64: 4, 1, 1>, scalar_prefetch = 0 : i64, scratch_operands = 1 : i64, tpu.core_type = #tpu.core_type<tc>, window_params = [{transform_indices = @transform_0, window_bounds = array<i64: 1, 128, 1>}, {transform_indices = @transform_1, window_bounds = array<i64: 1, 128, 1>}, {transform_indices = @transform_2, window_bounds = array<i64: 1, 1, 128>}, {transform_indices = @transform_3, window_bounds = array<i64: 1, 1, 128>}, {transform_indices = @transform_4, window_bounds = array<i64: 1, 128>}]} {
    %c0_i32 = arith.constant 0 : i32
    %0 = arith.cmpi eq, %arg1, %c0_i32 : i32
    %c0_i32_0 = arith.constant 0 : i32
    %1 = arith.cmpi eq, %arg2, %c0_i32_0 : i32
    %2 = arith.andi %0, %1 : i1
    %3 = arith.extui %2 : i1 to i32
    %c0_i32_1 = arith.constant 0 : i32
    %4 = arith.cmpi ne, %3, %c0_i32_1 : i32
    scf.if %4 {
      %cst_21 = arith.constant 0.000000e+00 : f32
      %36 = vector.broadcast %cst_21 : f32 to vector<1x128xf32>
      %c0_22 = arith.constant 0 : index
      %c0_23 = arith.constant 0 : index
      %37 = vector.load %arg7[%c0_22, %c0_23] : memref<1x128xf32, #tpu.memory_space<vmem>>, vector<1x128xf32>
      tpu.vector_store %arg7[%c0_22, %c0_23], %36 {strides = array<i32>} : memref<1x128xf32, #tpu.memory_space<vmem>>, vector<1x128xf32>,
    } else {
    }
    %c0_i32_2 = arith.constant 0 : i32
    %5 = arith.cmpi eq, %arg2, %c0_i32_2 : i32
    %6 = arith.extui %5 : i1 to i32
    %c0_i32_3 = arith.constant 0 : i32
    %7 = arith.cmpi ne, %6, %c0_i32_3 : i32
    scf.if %7 {
      %cst_21 = arith.constant 0.000000e+00 : f32
      %36 = vector.broadcast %cst_21 : f32 to vector<128x128xf32>
      %c0_22 = arith.constant 0 : index
      %c0_23 = arith.constant 0 : index
      %37 = vector.load %arg8[%c0_22, %c0_23] : memref<128x128xf32, #tpu.memory_space<vmem>>, vector<128x128xf32>
      tpu.vector_store %arg8[%c0_22, %c0_23], %36 {strides = array<i32>} : memref<128x128xf32, #tpu.memory_space<vmem>>, vector<128x128xf32>,
    } else {
    }
    %c0 = arith.constant 0 : index
    %c0_4 = arith.constant 0 : index
    %c0_5 = arith.constant 0 : index
    %8 = vector.load %arg3[%c0, %c0_4, %c0_5] : memref<1x128x1xf32, #tpu.memory_space<vmem>>, vector<1x128x1xf32>
    %9 = vector.shape_cast %8 : vector<1x128x1xf32> to vector<128x1xf32>
    %c0_6 = arith.constant 0 : index
    %c0_7 = arith.constant 0 : index
    %c0_8 = arith.constant 0 : index
    %10 = vector.load %arg5[%c0_6, %c0_7, %c0_8] : memref<1x1x128xf32, #tpu.memory_space<vmem>>, vector<1x1x128xf32>
    %11 = vector.shape_cast %10 : vector<1x1x128xf32> to vector<1x128xf32>
    %c0_9 = arith.constant 0 : index
    %c0_10 = arith.constant 0 : index
    %c0_11 = arith.constant 0 : index
    %12 = vector.load %arg6[%c0_9, %c0_10, %c0_11] : memref<1x1x128xf32, #tpu.memory_space<vmem>>, vector<1x1x128xf32>
    %13 = vector.shape_cast %12 : vector<1x1x128xf32> to vector<1x128xf32>
    %cst = arith.constant 0.000000e+00 : f32
    %14 = vector.broadcast %cst : f32 to vector<1x128xf32>
    %15 = arith.subf %14, %13 : vector<1x128xf32>
    %16 = vector.broadcast %9 : vector<128x1xf32> to vector<128x128xf32>
    %17 = vector.broadcast %11 : vector<1x128xf32> to vector<128x128xf32>
    %18 = arith.subf %16, %17 : vector<128x128xf32>
    %c0_12 = arith.constant 0 : index
    %c0_13 = arith.constant 0 : index
    %19 = vector.load %arg8[%c0_12, %c0_13] : memref<128x128xf32, #tpu.memory_space<vmem>>, vector<128x128xf32>
    %cst_14 = arith.constant 0.000000e+00 : f32
    %20 = vector.broadcast %cst_14 : f32 to vector<128x128xf32>
    %21 = arith.cmpf ogt, %18, %20 : vector<128x128xf32>
    %cst_15 = arith.constant 0.000000e+00 : f32
    %22 = vector.broadcast %cst_15 : f32 to vector<128x128xf32>
    %23 = arith.cmpf olt, %18, %22 : vector<128x128xf32>
    %cst_16 = arith.constant 0.000000e+00 : f32
    %24 = vector.shape_cast %15 : vector<1x128xf32> to vector<1x128xf32>
    %25 = vector.broadcast %24 : vector<1x128xf32> to vector<128x128xf32>
    %26 = vector.broadcast %cst_16 : f32 to vector<128x128xf32>
    %27 = arith.select %23, %25, %26 : vector<128x128xi1>, vector<128x128xf32>
    %28 = vector.shape_cast %13 : vector<1x128xf32> to vector<1x128xf32>
    %29 = vector.broadcast %28 : vector<1x128xf32> to vector<128x128xf32>
    %30 = arith.select %21, %29, %27 : vector<128x128xi1>, vector<128x128xf32>
    %31 = arith.addf %19, %30 : vector<128x128xf32>
    %c0_17 = arith.constant 0 : index
    %c0_18 = arith.constant 0 : index
    %32 = vector.load %arg8[%c0_17, %c0_18] : memref<128x128xf32, #tpu.memory_space<vmem>>, vector<128x128xf32>
    tpu.vector_store %arg8[%c0_17, %c0_18], %31 {strides = array<i32>} : memref<128x128xf32, #tpu.memory_space<vmem>>, vector<128x128xf32>,
    %c0_i32_19 = arith.constant 0 : i32
    %33 = arith.cmpi eq, %arg2, %c0_i32_19 : i32
    %34 = arith.extui %33 : i1 to i32
    %c0_i32_20 = arith.constant 0 : i32
    %35 = arith.cmpi ne, %34, %c0_i32_20 : i32
    scf.if %35 {
      %c0_21 = arith.constant 0 : index
      %c0_22 = arith.constant 0 : index
      %c0_23 = arith.constant 0 : index
      %36 = vector.load %arg4[%c0_21, %c0_22, %c0_23] : memref<1x128x1xf32, #tpu.memory_space<vmem>>, vector<1x128x1xf32>
      %37 = vector.shape_cast %36 : vector<1x128x1xf32> to vector<128x1xf32>
      %c0_24 = arith.constant 0 : index
      %c0_25 = arith.constant 0 : index
      %38 = vector.load %arg8[%c0_24, %c0_25] : memref<128x128xf32, #tpu.memory_space<vmem>>, vector<128x128xf32>
      %cst_26 = arith.constant dense<0.000000e+00> : vector<128xf32>
      %39 = vector.multi_reduction <add>, %38, %cst_26 [1] : vector<128x128xf32> to vector<128xf32>
      %40 = vector.shape_cast %39 : vector<128xf32> to vector<128x1xf32>
      %41 = arith.mulf %37, %40 : vector<128x1xf32>
      %42 = vector.shape_cast %41 : vector<128x1xf32> to vector<1x128x1xf32>
      %cst_27 = arith.constant dense<0.000000e+00> : vector<1xf32>
      %43 = vector.multi_reduction <add>, %42, %cst_27 [1, 2] : vector<1x128x1xf32> to vector<1xf32>
      %44 = vector.shape_cast %43 : vector<1xf32> to vector<1x1x1xf32>
      %45 = vector.extract %44[0, 0, 0] : f32 from vector<1x1x1xf32>
      %c0_28 = arith.constant 0 : index
      %c0_29 = arith.constant 0 : index
      %46 = vector.load %arg7[%c0_28, %c0_29] : memref<1x128xf32, #tpu.memory_space<vmem>>, vector<1x128xf32>
      %47 = vector.broadcast %45 : f32 to vector<1x128xf32>
      %48 = arith.addf %46, %47 : vector<1x128xf32>
      %c0_30 = arith.constant 0 : index
      %c0_31 = arith.constant 0 : index
      %49 = vector.load %arg7[%c0_30, %c0_31] : memref<1x128xf32, #tpu.memory_space<vmem>>, vector<1x128xf32>
      tpu.vector_store %arg7[%c0_30, %c0_31], %48 {strides = array<i32>} : memref<1x128xf32, #tpu.memory_space<vmem>>, vector<1x128xf32>,
    } else {
    }
    return
  }
  func.func @transform_0(%arg0: i32, %arg1: i32, %arg2: i32) -> (i32, i32, i32) {
    %c0_i32 = arith.constant 0 : i32
    %c0_i32_0 = arith.constant 0 : i32
    return %arg0, %arg1, %c0_i32 : i32, i32, i32
  }
  func.func @transform_1(%arg0: i32, %arg1: i32, %arg2: i32) -> (i32, i32, i32) {
    %c0_i32 = arith.constant 0 : i32
    %c0_i32_0 = arith.constant 0 : i32
    return %arg0, %arg1, %c0_i32 : i32, i32, i32
  }
  func.func @transform_2(%arg0: i32, %arg1: i32, %arg2: i32) -> (i32, i32, i32) {
    %c0_i32 = arith.constant 0 : i32
    %c0_i32_0 = arith.constant 0 : i32
    return %arg0, %c0_i32, %arg2 : i32, i32, i32
  }
  func.func @transform_3(%arg0: i32, %arg1: i32, %arg2: i32) -> (i32, i32, i32) {
    %c0_i32 = arith.constant 0 : i32
    %c0_i32_0 = arith.constant 0 : i32
    return %arg0, %c0_i32, %arg2 : i32, i32, i32
  }
  func.func @transform_4(%arg0: i32, %arg1: i32, %arg2: i32) -> (i32, i32) {
    %c0_i32 = arith.constant 0 : i32
    %c0_i32_0 = arith.constant 0 : i32
    return %c0_i32, %arg0 : i32, i32
  }
}

</mosaic_0001>

<bundles_post_ra>
// kernel: tpu_custom_call.1
= control target key start
LH: loop header
LB: loop body
LE: loop exit
PB: predicated region body
PF: predicated region fallthrough
CT: control target
= control target key end

     0   :  { %9 = vsyncpa [#allocation4], 0  ;;  %s1244_s0 = inlined_call_operand.vmem [shape: f32[4,128,1], index: 0, kind: input, shape index: {}]   ;;  %s1245_s1 = inlined_call_operand.vmem [shape: f32[4,128,1], index: 1, kind: input, shape index: {}]   ;;  %s1246_s2 = inlined_call_operand.vmem [shape: f32[4,1,128], index: 2, kind: input, shape index: {}]   ;;  %s1247_s3 = inlined_call_operand.vmem [shape: f32[4,1,128], index: 3, kind: input, shape index: {}]   ;;  %s1248_s4 = inlined_call_operand.hbm [shape: f32[1,512], index: 4, kind: output, shape index: {}]  }
   0x1   :  { %11 = vsyncpa [#allocation4 + $0x1], 0  ;;  %s1026_s15 = smov 0   ;;  %s1028_s16 = smov 0  }
   0x2   :  { %s1030_s17 = smov 0   ;;  %s1032_s18 = smov 0  }
   0x3   :  { %s1034_s19 = smov 0   ;;  %s1036_s20 = smov 0  }
   0x4 LB: > { %s842_s21 = sadd.s32 4294967295, %s996_s20   ;;  %s843_s22 = sadd.s32 4294967294, %s996_s20   ;;  %s996_s20 = sphi %s1036_s20, %s17_s20   ;;  %s992_s19 = sphi %s1034_s19, %s1255_s19   ;;  %s988_s18 = sphi %s1032_s18, %s1254_s18   ;;  %s984_s17 = sphi %s1030_s17, %s1253_s17   ;;  %s980_s16 = sphi %s1028_s16, %s1252_s16   ;;  %s976_s15 = sphi %s1026_s15, %s1251_s15  }
   0x5   : > { %s36_s23 = sadd.s32 1, %s992_s19  ;;  %s155_s24 = sadd.s32 1, %s984_s17 }
   0x6   : > { %p38_p0 = scmp.ge.s32.totalorder %s36_s23, 4  ;;  %p165_p1 = scmp.ne.s32.totalorder %s984_s17, %s980_s16 }
   0x7   : > { %p166_p2 = scmp.eq.s32.totalorder %s842_s21, 3  ;;  %p171_p3 = scmp.ne.s32.totalorder %s980_s16, %s976_s15 }
   0x8   : > { %s1257_s23 = smov (%p38_p0, %s36_s23), 0  ;;  %p172_p5 = scmp.eq.s32.totalorder %s843_s22, 3 }
   0x9   : > { %p1066_p4 = por %p166_p2, %p165_p1  ;;  %s152_s26 = ssub.s32 %s992_s19, %s1257_s23 }
   0xa   : > { %p846_p6 = scmp.ge.s32.totalorder %s996_s20, 1  ;;  %p153_p7 = scmp.eq.s32.totalorder %s152_s26, 0 }
   0xb   : > { %p1073_p8 = por %p172_p5, %p171_p3  ;;  %p234_p9 = scmp.lt.s32.totalorder %s996_s20, 5 }
   0xc   : > { %s1079_s28 = scalar_select %p153_p7, %s984_s17, %s155_s24  }
   0xd   : > { %p235_p10 = pnand %p846_p6, %p234_p9 }
   0xe   : > { %p285_p11 = scmp.lt.s32.totalorder (!%p235_p10), %s988_s18, 3  ;;  %v998_v0 = vmov (!%p235_p10), 0   ;;  %v512_v17 = vlaneseq (!%p235_p10)  ;;  %s282_s24 = sand.u32 (!%p235_p10), 1, %s980_s16  }
   0xf   : > { %238 = sbr.rel (%p235_p10) target bundleno = 560 (0x230), region = 36  ;;  %917 = vset.pattern.permute.xlu1 (!%p235_p10), %v998_v0  ;;  %916 = vset.pattern.permute.xlu0 (!%p235_p10), %v998_v0  ;;  %s283_s26 = scalar_lea.vmem (!%p235_p10), [#allocation3], %s282_s24 }
  0x10   : > { %v513_v18 = vshrl.u32 (!%p235_p10), %v512_v17, 7  ;;  %s716_s9 = scalar_lea.sflag (!%p235_p10), [#allocation4], %s282_s24 }
  0x12   : > { %v514_v21 = vsub.s32 (!%p235_p10), 0, %v513_v18 }
  0x16   : > { %s1083_s29 = scalar_select %p285_p11, %s988_s18, 3 }
  0x18   : > { %s855_s30 = sshll.u32 %s1083_s29, 7  ;;  %s315_s10 = scalar_lea.vmem %s1247_s3, %s1083_s29 }
  0x19   : > { %s292_s7 = scalar_lea.vmem %s1244_s0, %s855_s30  ;;  %v359_v19 = vld [vmem:[%s315_s10] sm:$0x1]  ;;  %s309_s13 = scalar_lea.vmem %s1246_s2, %s1083_s29 }
  0x1a   : > { %v344_v1 = vld [vmem:[%s292_s7 + $0x10] sm:$0xff]  ;;  %v342_v2 = vld [vmem:[%s292_s7] sm:$0xff]  ;;  %v345_v3 = vld [vmem:[%s292_s7 + $0x18] sm:$0xff]  ;;  %v360_v20 = vsub.f32 0.0, %v359_v19  ;;  %v1103_v26 = vrot.slane %v359_v19, %v514_v21  ;;  %s1158_s22 = scalar_lea.vmem %s1245_s1, %s855_s30  ;;  %s852_s29 = sshll.u32 %s988_s18, 4 }
  0x1b   : > { %373 = vperm.xlu1 %917, %v344_v1   ;;  %363 = vperm.xlu0 %916, %v342_v2   ;;  %v343_v4 = vld [vmem:[%s292_s7 + $0x8] sm:$0xff]  ;;  %v346_v6 = vld [vmem:[%s292_s7 + $0x20] sm:$0xff]  ;;  %v349_v7 = vld [vmem:[%s292_s7 + $0x38] sm:$0xff]  ;;  %s728_s30 = sshll.u32 %s283_s26, 4  ;;  %s1197_s8 = scalar_lea.hbm %s1248_s4, %s852_s29  ;;  %s1199_s30 = int_to_ptr.vmem [resolvable:$true] %s728_s30 }
  0x1c   : > { %v347_v5 = vld [vmem:[%s292_s7 + $0x28] sm:$0xff]  ;;  %v348_v8 = vld [vmem:[%s292_s7 + $0x30] sm:$0xff]  ;;  %v350_v10 = vld [vmem:[%s292_s7 + $0x40] sm:$0xff]  ;;  %v1101_v23 = vrot.slane %v360_v20, %v514_v21  ;;  %s918_s10 = scalar_lea.vmem %s1199_s30, 16  ;;  %s1000_s18 = smov [#allocation3]  }
  0x1d   : > { %v351_v9 = vld [vmem:[%s292_s7 + $0x48] sm:$0xff]  ;;  %v353_v11 = vld [vmem:[%s292_s7 + $0x58] sm:$0xff]  ;;  %v352_v12 = vld [vmem:[%s292_s7 + $0x50] sm:$0xff]  ;;  %p919_p12 = scmp.ne.s32.totalorder %s1199_s30, %s918_s10  ;;  %s922_s11 = sshll.u32 %s1000_s18, 4  ;;  %s923_s11 = int_to_ptr.vmem [resolvable:$false] %s922_s11 }
  0x1e   : > { %v355_v13 = vld [vmem:[%s292_s7 + $0x68] sm:$0xff]  ;;  %v354_v14 = vld [vmem:[%s292_s7 + $0x60] sm:$0xff]  ;;  %v357_v15 = vld [vmem:[%s292_s7 + $0x78] sm:$0xff]  ;;  %s924_s12 = scalar_lea.vmem %s923_s11, 32  ;;  %p925_p1 = scmp.lt.s32.totalorder %s1199_s30, %s923_s11 }
  0x1f   : > { %378 = vperm.xlu1 %917, %v345_v3   ;;  %368 = vperm.xlu0 %916, %v343_v4   ;;  %v356_v16 = vld [vmem:[%s292_s7 + $0x70] sm:$0xff]  ;;  %v1099_v22 = vld [vmem:[%s309_s13] ss:$0 sm:$0xff]  ;;  %p920_p13 = pnand %p919_p12, %p1066_p4  ;;  %p926_p2 = scmp.lt.s32.totalorder %s924_s12, %s918_s10 }
  0x21   : > { %p921_p0 = pneg %p920_p13  ;;  %p927_p3 = por %p926_p2, %p925_p1 }
  0x23   : > { %388 = vperm.xlu1 %917, %v347_v5   ;;  %383 = vperm.xlu0 %916, %v346_v6   ;;  %p928_p5 = pnand %p927_p3, %p921_p0 }
  0x27   : > { %398 = vperm.xlu1 %917, %v349_v7   ;;  %393 = vperm.xlu0 %916, %v348_v8  }
  0x2b   : > { %408 = vperm.xlu1 %917, %v351_v9   ;;  %403 = vperm.xlu0 %916, %v350_v10  }
  0x2f   : > { %418 = vperm.xlu1 %917, %v353_v11   ;;  %413 = vperm.xlu0 %916, %v352_v12  }
  0x33   : > { %428 = vperm.xlu1 %917, %v355_v13   ;;  %423 = vperm.xlu0 %916, %v354_v14  }
  0x37   : > { %438 = vperm.xlu1 %917, %v357_v15   ;;  %433 = vperm.xlu0 %916, %v356_v16  }
  0x9a   : > { %v374_v24 = vpop.permute.xlu1 %373  ;;  %v364_v25 = vpop.permute.xlu0 %363 }
  0x9b   : > { %v449_v27 = vsub.f32 %v374_v24, %v1099_v22  ;;  %v447_v28 = vsub.f32 %v364_v25, %v1099_v22 }
  0x9d   : > { %vm497_vm0 = vcmp.lt.f32.partialorder %v449_v27, 0.0  ;;  %vm479_vm1 = vcmp.gt.f32.partialorder %v447_v28, 0.0  ;;  %vm495_vm2 = vcmp.lt.f32.partialorder %v447_v28, 0.0  ;;  %vm481_vm3 = vcmp.gt.f32.partialorder %v449_v27, 0.0  ;;  %v590_v27 = vld [vmem:[%s1158_s22] sm:$0xff] }
  0x9e   : > { %v379_v29 = vpop.permute.xlu1 %378  ;;  %v369_v30 = vpop.permute.xlu0 %368  ;;  %v517_v31 = vsel %vm495_vm2, %v1101_v23, 0.0  ;;  %v519_v32 = vsel %vm497_vm0, %v1101_v23, 0.0 }
  0x9f   : > { %v450_v33 = vsub.f32 %v379_v29, %v1099_v22  ;;  %v448_v34 = vsub.f32 %v369_v30, %v1099_v22  ;;  %v539_v35 = vsel %vm479_vm1, %v1103_v26, %v517_v31  ;;  %v541_v36 = vsel %vm481_vm3, %v1103_v26, %v519_v32  ;;  %v591_v29 = vld [vmem:[%s1158_s22 + $0x8] sm:$0xff]  ;;  %v592_v30 = vld [vmem:[%s1158_s22 + $0x10] sm:$0xff] }
  0xa0   : > { %622 = vadd.xlane.f32.xlu0 %v539_v35  ;;  %v593_v35 = vld [vmem:[%s1158_s22 + $0x18] sm:$0xff] }
  0xa1   : > { %vm498_vm4 = vcmp.lt.f32.partialorder %v450_v33, 0.0  ;;  %vm480_vm5 = vcmp.gt.f32.partialorder %v448_v34, 0.0  ;;  %vm496_vm6 = vcmp.lt.f32.partialorder %v448_v34, 0.0  ;;  %vm482_vm7 = vcmp.gt.f32.partialorder %v450_v33, 0.0  ;;  %v594_v34 = vld [vmem:[%s1158_s22 + $0x20] sm:$0xff] }
  0xa2   : > { %v389_v37 = vpop.permute.xlu1 %388  ;;  %v384_v38 = vpop.permute.xlu0 %383  ;;  %v518_v39 = vsel %vm496_vm6, %v1101_v23, 0.0  ;;  %v520_v43 = vsel %vm498_vm4, %v1101_v23, 0.0 }
  0xa3   : > { %v452_v40 = vsub.f32 %v389_v37, %v1099_v22  ;;  %v451_v41 = vsub.f32 %v384_v38, %v1099_v22  ;;  %v540_v42 = vsel %vm480_vm5, %v1103_v26, %v518_v39  ;;  %v542_v49 = vsel %vm482_vm7, %v1103_v26, %v520_v43 }
  0xa4   : > { %626 = vadd.xlane.f32.xlu0 %v541_v36  ;;  %624 = vadd.xlane.f32.xlu1 %v540_v42 }
  0xa5   : > { %vm500_vm8 = vcmp.lt.f32.partialorder %v452_v40, 0.0  ;;  %vm483_vm9 = vcmp.gt.f32.partialorder %v451_v41, 0.0  ;;  %vm499_vm10 = vcmp.lt.f32.partialorder %v451_v41, 0.0  ;;  %vm484_vm11 = vcmp.gt.f32.partialorder %v452_v40, 0.0 }
  0xa6   : > { %v399_v44 = vpop.permute.xlu1 %398  ;;  %v394_v45 = vpop.permute.xlu0 %393  ;;  %v521_v46 = vsel %vm499_vm10, %v1101_v23, 0.0  ;;  %v522_v51 = vsel %vm500_vm8, %v1101_v23, 0.0 }
  0xa7   : > { %v454_v47 = vsub.f32 %v399_v44, %v1099_v22  ;;  %v453_v48 = vsub.f32 %v394_v45, %v1099_v22  ;;  %v543_v50 = vsel %vm483_vm9, %v1103_v26, %v521_v46  ;;  %v544_v57 = vsel %vm484_vm11, %v1103_v26, %v522_v51  ;;  %v596_v45 = vld [vmem:[%s1158_s22 + $0x30] sm:$0xff]  ;;  %v595_v46 = vld [vmem:[%s1158_s22 + $0x28] sm:$0xff] }
  0xa8   : > { %628 = vadd.xlane.f32.xlu0 %v542_v49  ;;  %630 = vadd.xlane.f32.xlu1 %v543_v50 }
  0xa9   : > { %vm502_vm12 = vcmp.lt.f32.partialorder %v454_v47, 0.0  ;;  %vm485_vm13 = vcmp.gt.f32.partialorder %v453_v48, 0.0  ;;  %vm501_vm14 = vcmp.lt.f32.partialorder %v453_v48, 0.0  ;;  %vm486_vm15 = vcmp.gt.f32.partialorder %v454_v47, 0.0 }
  0xaa   : > { %v409_v52 = vpop.permute.xlu1 %408  ;;  %v404_v53 = vpop.permute.xlu0 %403  ;;  %v523_v54 = vsel %vm501_vm14, %v1101_v23, 0.0  ;;  %v524_v59 = vsel %vm502_vm12, %v1101_v23, 0.0 }
  0xab   : > { %v456_v55 = vsub.f32 %v409_v52, %v1099_v22  ;;  %v455_v56 = vsub.f32 %v404_v53, %v1099_v22  ;;  %v545_v58 = vsel %vm485_vm13, %v1103_v26, %v523_v54  ;;  %v546_v1 = vsel %vm486_vm15, %v1103_v26, %v524_v59 }
  0xac   : > { %632 = vadd.xlane.f32.xlu0 %v544_v57  ;;  %634 = vadd.xlane.f32.xlu1 %v545_v58 }
  0xad   : > { %vm504_vm0 = vcmp.lt.f32.partialorder %v456_v55, 0.0  ;;  %vm487_vm1 = vcmp.gt.f32.partialorder %v455_v56, 0.0  ;;  %vm503_vm2 = vcmp.lt.f32.partialorder %v455_v56, 0.0  ;;  %vm488_vm3 = vcmp.gt.f32.partialorder %v456_v55, 0.0  ;;  %v598_v55 = vld [vmem:[%s1158_s22 + $0x40] sm:$0xff]  ;;  %v597_v56 = vld [vmem:[%s1158_s22 + $0x38] sm:$0xff] }
  0xae   : > { %v419_v60 = vpop.permute.xlu1 %418  ;;  %v414_v61 = vpop.permute.xlu0 %413  ;;  %v525_v62 = vsel %vm503_vm2, %v1101_v23, 0.0  ;;  %v526_v3 = vsel %vm504_vm0, %v1101_v23, 0.0  ;;  %vm670_vm0 = vcmask 7168  }
  0xaf   : > { %v458_v63 = vsub.f32 %v419_v60, %v1099_v22  ;;  %v457_v0 = vsub.f32 %v414_v61, %v1099_v22  ;;  %v547_v2 = vsel %vm487_vm1, %v1103_v26, %v525_v62  ;;  %v548_v9 = vsel %vm488_vm3, %v1103_v26, %v526_v3 }
  0xb0   : > { %636 = vadd.xlane.f32.xlu0 %v546_v1  ;;  %638 = vadd.xlane.f32.xlu1 %v547_v2  ;;  %v600_v1 = vld [vmem:[%s1158_s22 + $0x50] sm:$0xff]  ;;  %v599_v2 = vld [vmem:[%s1158_s22 + $0x48] sm:$0xff] }
  0xb1   : > { %vm506_vm4 = vcmp.lt.f32.partialorder %v458_v63, 0.0  ;;  %vm489_vm5 = vcmp.gt.f32.partialorder %v457_v0, 0.0  ;;  %vm505_vm6 = vcmp.lt.f32.partialorder %v457_v0, 0.0  ;;  %vm490_vm7 = vcmp.gt.f32.partialorder %v458_v63, 0.0 }
  0xb2   : > { %v429_v4 = vpop.permute.xlu1 %428  ;;  %v424_v5 = vpop.permute.xlu0 %423  ;;  %v527_v6 = vsel %vm505_vm6, %v1101_v23, 0.0  ;;  %v528_v11 = vsel %vm506_vm4, %v1101_v23, 0.0 }
  0xb3   : > { %v460_v7 = vsub.f32 %v429_v4, %v1099_v22  ;;  %v459_v8 = vsub.f32 %v424_v5, %v1099_v22  ;;  %v549_v10 = vsel %vm489_vm5, %v1103_v26, %v527_v6  ;;  %v550_v17 = vsel %vm490_vm7, %v1103_v26, %v528_v11  ;;  %v602_v11 = vld [vmem:[%s1158_s22 + $0x60] sm:$0xff] }
  0xb4   : > { %640 = vadd.xlane.f32.xlu0 %v548_v9  ;;  %642 = vadd.xlane.f32.xlu1 %v549_v10 }
  0xb5   : > { %vm508_vm8 = vcmp.lt.f32.partialorder %v460_v7, 0.0  ;;  %vm491_vm9 = vcmp.gt.f32.partialorder %v459_v8, 0.0  ;;  %vm507_vm10 = vcmp.lt.f32.partialorder %v459_v8, 0.0  ;;  %vm492_vm11 = vcmp.gt.f32.partialorder %v460_v7, 0.0 }
  0xb6   : > { %v439_v12 = vpop.permute.xlu1 %438  ;;  %v434_v13 = vpop.permute.xlu0 %433  ;;  %v529_v14 = vsel %vm507_vm10, %v1101_v23, 0.0  ;;  %v530_v19 = vsel %vm508_vm8, %v1101_v23, 0.0 }
  0xb7   : > { %v462_v15 = vsub.f32 %v439_v12, %v1099_v22  ;;  %v461_v16 = vsub.f32 %v434_v13, %v1099_v22  ;;  %v551_v18 = vsel %vm491_vm9, %v1103_v26, %v529_v14  ;;  %v552_v21 = vsel %vm492_vm11, %v1103_v26, %v530_v19  ;;  %v601_v12 = vld [vmem:[%s1158_s22 + $0x58] sm:$0xff] }
  0xb8   : > { %644 = vadd.xlane.f32.xlu0 %v550_v17  ;;  %646 = vadd.xlane.f32.xlu1 %v551_v18 }
  0xb9   : > { %vm510_vm12 = vcmp.lt.f32.partialorder %v462_v15, 0.0  ;;  %vm493_vm13 = vcmp.gt.f32.partialorder %v461_v16, 0.0  ;;  %vm509_vm14 = vcmp.lt.f32.partialorder %v461_v16, 0.0  ;;  %vm494_vm15 = vcmp.gt.f32.partialorder %v462_v15, 0.0 }
  0xba   : > { %v531_v20 = vsel %vm509_vm14, %v1101_v23, 0.0  ;;  %v532_v22 = vsel %vm510_vm12, %v1101_v23, 0.0 }
  0xbb   : > { %v553_v24 = vsel %vm493_vm13, %v1103_v26, %v531_v20  ;;  %v554_v25 = vsel %vm494_vm15, %v1103_v26, %v532_v22 }
  0xbc   : > { %648 = vadd.xlane.f32.xlu0 %v552_v21  ;;  %650 = vadd.xlane.f32.xlu1 %v553_v24  ;;  %v604_v21 = vld [vmem:[%s1158_s22 + $0x70] sm:$0xff]  ;;  %v603_v24 = vld [vmem:[%s1158_s22 + $0x68] sm:$0xff] }
  0xc0   : > { %652 = vadd.xlane.f32.xlu0 %v554_v25 }
 0x12d   : > { %v623_v28 = vpop.xlane.xlu0 %622 }
 0x12e   : > { %v654_v31 = vmul.f32 %v623_v28, %v590_v27 }
 0x130   : > { %v671_v36 = vsel %vm670_vm0, %v654_v31, 0.0 }
 0x131   : > { %v625_v23 = vpop.xlane.xlu1 %624  ;;  %v627_v26 = vpop.xlane.xlu0 %626 }
 0x132   : > { %v655_v32 = vmul.f32 %v625_v23, %v591_v29  ;;  %v656_v33 = vmul.f32 %v627_v26, %v592_v30  ;;  %v605_v26 = vld [vmem:[%s1158_s22 + $0x78] sm:$0xff] }
 0x134   : > { %v672_v37 = vsel %vm670_vm0, %v655_v32, 0.0  ;;  %v674_v41 = vsel %vm670_vm0, %v656_v33, 0.0 }
 0x135   : > { %v673_v38 = vadd.f32 %v672_v37, %v671_v36  ;;  %v631_v39 = vpop.xlane.xlu1 %630  ;;  %v629_v40 = vpop.xlane.xlu0 %628 }
 0x136   : > { %v658_v42 = vmul.f32 %v631_v39, %v594_v34  ;;  %v657_v43 = vmul.f32 %v629_v40, %v593_v35  ;;  %v999_v40 = vmov 0.0  }
 0x137   : > { %v675_v44 = vadd.f32 %v674_v41, %v673_v38  ;;  %322 = vst [vmem:[%s283_s26] sm:$0x1] %v999_v40 }
 0x138   : > { %v676_v47 = vsel %vm670_vm0, %v657_v43, 0.0  ;;  %v678_v51 = vsel %vm670_vm0, %v658_v42, 0.0 }
 0x139   : > { %v677_v48 = vadd.f32 %v676_v47, %v675_v44  ;;  %v635_v49 = vpop.xlane.xlu1 %634  ;;  %v633_v50 = vpop.xlane.xlu0 %632 }
 0x13a   : > { %v660_v52 = vmul.f32 %v635_v49, %v596_v45  ;;  %v659_v53 = vmul.f32 %v633_v50, %v595_v46 }
 0x13b   : > { %v679_v54 = vadd.f32 %v678_v51, %v677_v48 }
 0x13c   : > { %v680_v57 = vsel %vm670_vm0, %v659_v53, 0.0  ;;  %v682_v61 = vsel %vm670_vm0, %v660_v52, 0.0 }
 0x13d   : > { %v681_v58 = vadd.f32 %v680_v57, %v679_v54  ;;  %v639_v59 = vpop.xlane.xlu1 %638  ;;  %v637_v60 = vpop.xlane.xlu0 %636 }
 0x13e   : > { %v662_v62 = vmul.f32 %v639_v59, %v598_v55  ;;  %v661_v63 = vmul.f32 %v637_v60, %v597_v56  ;;  %v711_v48 = vld [vmem:[%s283_s26] sm:$0x1] }
 0x13f   : > { %v683_v0 = vadd.f32 %v682_v61, %v681_v58 }
 0x140   : > { %v684_v3 = vsel %vm670_vm0, %v661_v63, 0.0  ;;  %v686_v7 = vsel %vm670_vm0, %v662_v62, 0.0 }
 0x141   : > { %v685_v4 = vadd.f32 %v684_v3, %v683_v0  ;;  %v643_v5 = vpop.xlane.xlu1 %642  ;;  %v641_v6 = vpop.xlane.xlu0 %640 }
 0x142   : > { %v664_v8 = vmul.f32 %v643_v5, %v600_v1  ;;  %v663_v9 = vmul.f32 %v641_v6, %v599_v2 }
 0x143   : > { %v687_v10 = vadd.f32 %v686_v7, %v685_v4 }
 0x144   : > { %v688_v13 = vsel %vm670_vm0, %v663_v9, 0.0  ;;  %v690_v17 = vsel %vm670_vm0, %v664_v8, 0.0 }
 0x145   : > { %v689_v14 = vadd.f32 %v688_v13, %v687_v10  ;;  %v647_v15 = vpop.xlane.xlu1 %646  ;;  %v645_v16 = vpop.xlane.xlu0 %644 }
 0x146   : > { %v666_v18 = vmul.f32 %v647_v15, %v602_v11  ;;  %v665_v19 = vmul.f32 %v645_v16, %v601_v12 }
 0x147   : > { %v691_v20 = vadd.f32 %v690_v17, %v689_v14 }
 0x148   : > { %v692_v22 = vsel %vm670_vm0, %v665_v19, 0.0  ;;  %v694_v29 = vsel %vm670_vm0, %v666_v18, 0.0 }
 0x149   : > { %v693_v25 = vadd.f32 %v692_v22, %v691_v20  ;;  %v651_v27 = vpop.xlane.xlu1 %650  ;;  %v649_v28 = vpop.xlane.xlu0 %648 }
 0x14a   : > { %v668_v30 = vmul.f32 %v651_v27, %v604_v21  ;;  %v667_v31 = vmul.f32 %v649_v28, %v603_v24 }
 0x14b   : > { %v695_v23 = vadd.f32 %v694_v29, %v693_v25 }
 0x14c   : > { %v696_v32 = vsel %vm670_vm0, %v667_v31, 0.0  ;;  %v698_v35 = vsel %vm670_vm0, %v668_v30, 0.0 }
 0x14d   : > { %v697_v33 = vadd.f32 %v696_v32, %v695_v23  ;;  %v653_v34 = vpop.xlane.xlu0 %652 }
 0x14e   : > { %v669_v36 = vmul.f32 %v653_v34, %v605_v26 }
 0x14f   : > { %v699_v37 = vadd.f32 %v698_v35, %v697_v33 }
 0x150   : > { %v700_v38 = vsel %vm670_vm0, %v669_v36, 0.0 }
 0x151   : > { %v701_v39 = vadd.f32 %v700_v38, %v699_v37 }
 0x153   : > { %702 = vadd.xlane.f32.xlu1 %v701_v39 }
 0x1e0   : > { %v703_v41 = vpop.xlane.xlu1 %702 }
 0x1e1   : > { %v704_v42 = vrot.slane %v703_v41, 4 }
 0x1e3   : > { %v705_v43 = vadd.f32 %v704_v42, %v703_v41 }
 0x1e5   : > { %v706_v44 = vrot.slane %v705_v43, 2 }
 0x1e7   : > { %v707_v45 = vadd.f32 %v706_v44, %v705_v43 }
 0x1e9   : > { %v708_v46 = vrot.slane %v707_v45, 1 }
 0x1eb   : > { %v709_v47 = vadd.f32 %v708_v46, %v707_v45 }
 0x1ed   : > { %857 = vpush %v709_v47 }
 0x21e   : > { %s858_s5 = spop %857 }
 0x21f   : > { %v712_v49 = vstv %s858_s5 }
 0x220   : > { %v713_v50 = vadd.f32 %v712_v49, %v711_v48 }
 0x222   : > { %714 = vst [vmem:[%s283_s26] sm:$0x1] %v713_v50 }
 0x223   : > { %931 = shalt.err (!%p928_p5)
}
 0x224   : > { %s932_s13 = scalar_lea.hbm %s1197_s8, 16  ;;  %s936_s22 = scalar_lea.hbm %s1248_s4, 64 }
 0x225   : > { %p933_p6 = scmp.ne.s32.totalorder %s1197_s8, %s932_s13  ;;  %p937_p10 = scmp.lt.u32.totalorder %s1197_s8, %s1248_s4 }
 0x226   : > { %p938_p11 = scmp.lt.u32.totalorder %s936_s22, %s932_s13  ;;  %p940_p13 = scmp.lt.u32.totalorder %s932_s13, %s1197_s8 }
 0x227   : > { %p934_p7 = pnand %p933_p6, %p1066_p4 }
 0x228   : > { %p939_p12 = por %p938_p11, %p937_p10 }
 0x229   : > { %p935_p9 = pneg %p934_p7 }
 0x22a   : > { %p941_p0 = por %p940_p13, %p939_p12 }
 0x22c   : > { %p942_p1 = pnand %p941_p0, %p935_p9 }
 0x22e   : > { %945 = shalt.err (!%p942_p1)
}
 0x22f   : > { %859 = dma.vmem_to_hbm [thread:$0]  (%p1066_p4), %s1199_s30, 16, %s1197_s8, %s716_s9  }
 0x230 PF: > { %p865_p2 = scmp.ge.s32.totalorder %s996_s20, 2  ;;  %s740_s29 = sand.u32 1, %s976_s15  }
 0x231   : > { %s741_s5 = scalar_lea.sflag [#allocation4], %s740_s29 }
 0x232   : > { %p862_p3 = pnand %p865_p2, %p1073_p8 }
 0x234   : > { %971 = dma.done.wait (!%p862_p3), %s741_s5, 16  }
 0x235   : > { %973 = vsyncadd (!%p862_p3), %s741_s5, 4294967280  ;;  %s17_s20 = sadd.s32 1, %s996_s20   ;;  %s1251_s15 = smov %s980_s16 }
 0x236   : > { %p14_p5 = scmp.ge.s32.totalorder %s17_s20, 6   ;;  %s1252_s16 = smov %s984_s17 }
 0x237   : > { %s1253_s17 = smov %s1079_s28  ;;  %s1254_s18 = smov %s992_s19 }
 0x238   : > { %s1255_s19 = smov %s1257_s23  ;;  %16 = sbr.rel (!%p14_p5) target bundleno = 4 (0x4), region = 92 }
 0x23f   :  { %745 = vsyncpa [#allocation4], 1 }
 0x240   :  { %747 = vsyncpa [#allocation4 + $0x1], 1 }

</bundles_post_ra>
